<compile_context>
chip_gen: v5e
topology: v5e:2x2
jax: 0.10.0
libtpu: 0.0.40
codegen_flags: <defaults>
</compile_context>

<pallas_src>
from functools import partial

import jax
import jax.numpy as jnp
from jax.experimental import pallas as pl
from jax.experimental.pallas import tpu as pltpu


def _identity_kernel(x_ref, o_ref):
    # Identity copy: the reference Encoder defines no transformation.
    o_ref[...] = x_ref[...]


def _debug_passthrough(states):
    """Scaffold Pallas kernel over `states` (NOT used by Encoder.forward).

    Full-array, untiled VMEM block; output aliases the input buffer.
    """
    return pl.pallas_call(
        _identity_kernel,
        out_shape=jax.ShapeDtypeStruct(states.shape, states.dtype),
        in_specs=[pl.BlockSpec(memory_space=pltpu.MemorySpace.VMEM)],
        out_specs=pl.BlockSpec(memory_space=pltpu.MemorySpace.VMEM),
        input_output_aliases={0: 0},
    )(states)


# Donate the input so the in/out alias is realized with no extra XLA copy.
_debug_passthrough_jit = jax.jit(_debug_passthrough, donate_argnums=(0,))


class Encoder:
    """JAX/Pallas port of the PyTorch Encoder stub."""

    def __init__(self, input_dim, num_layers=2, hidden_size=512,
                 history_length=1, concat_action=False, dropout=0.0):
        # Matches the PyTorch __init__: no parameters are allocated.
        self.hidden_size = self.feature_dim = hidden_size
        self.input_dim = input_dim
        self.history_length = history_length

    def forward(self, states, actions=None):
        # Reference forward() performs no computation and returns None.
        # Per the perf review, no Pallas kernel is launched here: the result
        # would be discarded, so the launch is 100% overhead.
        return None

    def __call__(self, states, actions=None):
        return self.forward(states, actions)


if __name__ == "__main__":
    key = jax.random.PRNGKey(0)

    batch = 2
    history_length = 1
    input_dim = 32
    hidden_size = 32  # small, consistent with the module's hidden_size arg

    states_shape = (batch, history_length, input_dim)
    states = jax.random.normal(key, states_shape, dtype=jnp.float32)

    enc = Encoder(input_dim=input_dim, hidden_size=hidden_size,
                  history_length=history_length)

    # Forward-pass semantics: the encoder returns None (no kernel launched).
    out = enc(states)
    assert out is None

    # Exercise the scaffold Pallas kernel once, directly (states is donated,
    # so regenerate the expected values from the same deterministic key).
    kernel_out = _debug_passthrough_jit(states)
    jax.block_until_ready(kernel_out)

    expected = jax.random.normal(key, states_shape, dtype=jnp.float32)
    assert kernel_out.shape == states_shape
    assert jnp.allclose(kernel_out, expected)

    print("KERNEL_OK")
</pallas_src>

<mosaic_0001>
module attributes {stable_mosaic.version = 11 : i64} {
  func.func @_identity_kernel(%arg0: memref<2x1x32xf32, #tpu.memory_space<vmem>>, %arg1: memref<2x1x32xf32, #tpu.memory_space<vmem>>) attributes {dimension_semantics = [], scalar_prefetch = 0 : i64, scratch_operands = 0 : i64, tpu.core_type = #tpu.core_type<tc>} {
    %c0 = arith.constant 0 : index
    %c0_0 = arith.constant 0 : index
    %c0_1 = arith.constant 0 : index
    %0 = vector.load %arg0[%c0, %c0_0, %c0_1] : memref<2x1x32xf32, #tpu.memory_space<vmem>>, vector<2x1x32xf32>
    %c0_2 = arith.constant 0 : index
    %c0_3 = arith.constant 0 : index
    %c0_4 = arith.constant 0 : index
    %1 = vector.load %arg1[%c0_2, %c0_3, %c0_4] : memref<2x1x32xf32, #tpu.memory_space<vmem>>, vector<2x1x32xf32>
    tpu.vector_store %arg1[%c0_2, %c0_3, %c0_4], %0 {strides = array<i32>} : memref<2x1x32xf32, #tpu.memory_space<vmem>>, vector<2x1x32xf32>,
    return
  }
}

</mosaic_0001>

<bundles_post_ra>
// kernel: _debug_passthrough.1
= control target key start
LH: loop header
LB: loop body
LE: loop exit
PB: predicated region body
PF: predicated region fallthrough
CT: control target
= control target key end

     0   :  { %6 = vsyncpa [#allocation3], 0  ;;  %s125_s0 = inlined_call_operand.hbm [shape: f32[2,1,32], index: 0, kind: input, shape index: {}, may-alias: {0,1}]   ;;  %s126_s1 = inlined_call_operand.hbm [shape: f32[2,1,32], index: 1, kind: output, shape index: {}, may-alias: {0,1}]  }
   0x1   :  { %7 = vsyncpa [#allocation4], 0  ;;  %s12_s8 = sshll.u32 %s125_s0, 4  ;;  %s105_s9 = smov [#allocation2]   ;;  %s13_s8 = int_to_ptr.hbm [resolvable:$true] %s12_s8 }
   0x2   :  { %s14_s10 = sshll.u32 %s105_s9, 4  ;;  %s106_s11 = smov 16   ;;  %s15_s10 = int_to_ptr.vmem [resolvable:$true] %s14_s10 }
   0x3   :  { %s107_s12 = smov 1  }
   0x4   :  { %20 = dma.hbm_to_vmem [thread:$0]  %s13_s8, 32, %s15_s10, [#allocation3], %s106_s11, %s106_s11, %s107_s12  }
   0x5   :  { %101 = dma.done.wait [#allocation3], 32  }
   0x6   :  { %102 = vsyncadd [#allocation3], 4294967264  ;;  %s108_s13 = smov [#allocation5]   ;;  %s36_s17 = sshll.u32 %s126_s1, 4  ;;  %vm27_vm0 = vcmask 253952   ;;  %s37_s17 = int_to_ptr.hbm [resolvable:$true] %s36_s17 }
   0x7   :  { %s34_s14 = sshll.u32 %s108_s13, 4  ;;  %v25_v0 = vld [vmem:[#allocation2] sm:$0x1]  ;;  %v26_v1 = vld [vmem:[#allocation2 + $0x1] sm:$0x1]  ;;  %s35_s14 = int_to_ptr.vmem [resolvable:$true] %s34_s14 }
   0x8   :  { %28 = vst.msk [vmem:[#allocation5] sm:$0x1] %vm27_vm0, %v25_v0 }
   0x9   :  { %29 = vst.msk [vmem:[#allocation5 + $0x1] sm:$0x1] %vm27_vm0, %v26_v1 }
   0xa   :  { %42 = dma.vmem_to_hbm [thread:$0]  %s35_s14, 32, %s37_s17, [#allocation4], %s106_s11, %s106_s11, %s107_s12  }
   0xb   :  { %103 = dma.done.wait [#allocation4], 32  }
   0xc   :  { %104 = vsyncadd [#allocation4], 4294967264 }
   0xd   :  { %47 = vsyncpa [#allocation3], 1 }
   0xe   :  { %48 = vsyncpa [#allocation4], 1 }

</bundles_post_ra>
